<compile_context>
chip_gen: v7x
topology: tpu7x:2x2x1
jax: 0.10.0
libtpu: 0.0.40
codegen_flags: <defaults>
</compile_context>

<pallas_src>
import functools
import math

import jax
import jax.numpy as jnp
from jax.experimental import pallas as pl
from jax.experimental.pallas import tpu as pltpu


def _round_up(x, m):
    return ((x + m - 1) // m) * m


# ----------------------------------------------------------------------------
# Kernel 1: fused Q/K/V projection   qkv = x @ [Wq^T | Wk^T | Wv^T] + [bq|bk|bv]
# ----------------------------------------------------------------------------
def _qkv_proj_kernel(x_ref, w_ref, b_ref, o_ref):
    acc = jnp.dot(x_ref[...], w_ref[...],
                  preferred_element_type=jnp.float32)          # (tm, 3H) f32 acc
    acc = acc + b_ref[...].astype(jnp.float32)                 # (1, 3H) broadcast
    o_ref[...] = acc.astype(o_ref.dtype)


# ----------------------------------------------------------------------------
# Kernel 2: per-batch multi-head attention, reading heads straight from the
#           (S, 3H) qkv slab and writing merged heads to a lane-dense (S, H)
#           output block.
# ----------------------------------------------------------------------------
def _attention_kernel(*refs, num_heads, head_dim, scale, has_mask):
    if has_mask:
        qkv_ref, mask_ref, o_ref = refs
        mask = mask_ref[0].astype(jnp.float32)                 # (1, S) per-key add
    else:
        qkv_ref, o_ref = refs
        mask = None

    H = num_heads * head_dim
    outs = []
    # Unrolled static loop over heads; every slice below is a static column
    # slice of the resident (S, 3H) qkv block -- no wrapper-side transposes.
    for h in range(num_heads):
        lo = h * head_dim
        q = qkv_ref[:, lo:lo + head_dim]                       # (S, d) native dtype
        k = qkv_ref[:, H + lo:H + lo + head_dim]               # (S, d)
        v = qkv_ref[:, 2 * H + lo:2 * H + lo + head_dim]       # (S, d)

        # scores = (q @ k^T) * scale (+ mask); MXU runs in the native dtype,
        # accumulation in f32.
        s = jax.lax.dot_general(q, k, (((1,), (1,)), ((), ())),
                                preferred_element_type=jnp.float32)   # (S, S)
        s = s * scale
        if mask is not None:
            s = s + mask

        # Numerically stable softmax; normalization is deferred past the PV
        # matmul (S*d multiply instead of an S*S divide pass).
        s = s - jnp.max(s, axis=-1, keepdims=True)
        p = jnp.exp(s)
        l = jnp.sum(p, axis=-1, keepdims=True)                 # (S, 1) f32

        ctx = jnp.dot(p.astype(v.dtype), v,
                      preferred_element_type=jnp.float32)      # (S, d) f32
        # pl.reciprocal(..., approx=True) is cheaper (EUP) but less accurate.
        ctx = ctx * pl.reciprocal(l)
        outs.append(ctx)

    # Merge heads into contiguous H-wide columns (== permute(0,2,1,3).view in
    # the PyTorch reference) and store once, lane-dense.
    o_ref[...] = jnp.concatenate(outs, axis=-1).astype(o_ref.dtype)


# ----------------------------------------------------------------------------
# Kernel 3: self-output  LayerNorm(ctx @ Wo^T + bo + residual)
# ----------------------------------------------------------------------------
def _self_output_kernel(ctx_ref, inp_ref, w_ref, b_ref, gamma_ref, beta_ref,
                        o_ref, *, eps):
    h = jnp.dot(ctx_ref[...], w_ref[...],
                preferred_element_type=jnp.float32)            # (tm, H) f32 acc
    h = h + b_ref[...].astype(jnp.float32) + inp_ref[...].astype(jnp.float32)

    # torch.nn.LayerNorm: biased variance, eps inside the sqrt, affine params.
    mean = jnp.mean(h, axis=-1, keepdims=True)
    var = jnp.mean(jnp.square(h - mean), axis=-1, keepdims=True)
    h = (h - mean) * jax.lax.rsqrt(var + eps)
    h = h * gamma_ref[...].astype(jnp.float32) + beta_ref[...].astype(jnp.float32)
    o_ref[...] = h.astype(o_ref.dtype)


# ----------------------------------------------------------------------------
# One-time parameter preparation (hoisted out of the per-layer call; ALBERT
# shares these weights across layers).
# ----------------------------------------------------------------------------
def prepare_albert_attention_params(params, dtype):
    wqkv_t = jnp.concatenate(
        [params["wq"].T, params["wk"].T, params["wv"].T], axis=1).astype(dtype)
    bqkv = jnp.concatenate(
        [params["bq"], params["bk"], params["bv"]]).reshape(1, -1).astype(dtype)
    return {
        "wqkv_t": wqkv_t,                                   # (H, 3H)
        "bqkv": bqkv,                                       # (1, 3H)
        "wo_t": params["wo"].T.astype(dtype),               # (H, H)
        "bo": params["bo"].reshape(1, -1).astype(dtype),    # (1, H)
        "ln_gamma": params["ln_gamma"].reshape(1, -1).astype(dtype),
        "ln_beta": params["ln_beta"].reshape(1, -1).astype(dtype),
    }


# ----------------------------------------------------------------------------
# Wrapper
# ----------------------------------------------------------------------------
def albert_attention(hidden_states, prepared, *, num_attention_heads,
                     attention_mask=None, layer_norm_eps=1e-12,
                     row_tile_target=256,
                     vmem_limit_bytes=48 * 1024 * 1024):
    """hidden_states: (B, S, H) -> attention output (B, S, H).

    `prepared` comes from prepare_albert_attention_params(). attention_mask is
    the usual ADDITIVE extended mask of shape (B, S) or (B, 1, 1, S).
    On v5e/v6e (128 MiB VMEM) row_tile_target=512 / vmem_limit_bytes~=100 MiB
    are better; the defaults stay within v7x's 64 MiB physical VMEM.
    """
    B, S, H = hidden_states.shape
    nH = num_attention_heads
    assert H % nH == 0, "hidden_size must be a multiple of num_attention_heads"
    d = H // nH
    M = B * S
    out_dtype = hidden_states.dtype

    # Large MXU-friendly row tile (multiple of 8); pad rows instead of asserting.
    tm = min(row_tile_target, _round_up(M, 8))
    Mp = _round_up(M, tm)

    x2d = hidden_states.reshape(M, H)
    x2d_p = jnp.pad(x2d, ((0, Mp - M), (0, 0))) if Mp != M else x2d

    row_cparams = pltpu.CompilerParams(
        dimension_semantics=("parallel",),
        vmem_limit_bytes=vmem_limit_bytes)

    # --- Stage 1: fused QKV projection, tiled over rows ---------------------
    qkv = pl.pallas_call(
        _qkv_proj_kernel,
        out_shape=jax.ShapeDtypeStruct((Mp, 3 * H), out_dtype),
        grid=(Mp // tm,),
        in_specs=[
            pl.BlockSpec((tm, H), lambda i: (i, 0)),
            pl.BlockSpec((H, 3 * H), lambda i: (0, 0)),     # resident weights
            pl.BlockSpec((1, 3 * H), lambda i: (0, 0)),
        ],
        out_specs=pl.BlockSpec((tm, 3 * H), lambda i: (i, 0)),
        compiler_params=row_cparams,
    )(x2d_p, prepared["wqkv_t"], prepared["bqkv"])

    # --- Stage 2: attention, one grid step per batch, all heads in-kernel ---
    has_mask = attention_mask is not None
    operands = [qkv]
    in_specs = [pl.BlockSpec((S, 3 * H), lambda b: (b, 0))]
    if has_mask:
        if attention_mask.shape == (B, S):
            mask = attention_mask
        elif attention_mask.shape == (B, 1, 1, S):
            mask = attention_mask.reshape(B, S)
        else:
            raise ValueError(
                "attention_mask must have shape (B, S) or (B, 1, 1, S); got "
                f"{attention_mask.shape}")
        mask = mask.reshape(B, 1, S).astype(jnp.float32)
        operands.append(mask)
        in_specs.append(pl.BlockSpec((1, 1, S), lambda b: (b, 0, 0)))

    ctx2d = pl.pallas_call(
        functools.partial(_attention_kernel, num_heads=nH, head_dim=d,
                          scale=1.0 / math.sqrt(d), has_mask=has_mask),
        out_shape=jax.ShapeDtypeStruct((Mp, H), out_dtype),
        grid=(B,),
        in_specs=in_specs,
        out_specs=pl.BlockSpec((S, H), lambda b: (b, 0)),
        compiler_params=pltpu.CompilerParams(
            dimension_semantics=("parallel",),
            vmem_limit_bytes=vmem_limit_bytes),
    )(*operands)
    # Note: rows >= M of ctx2d (padding tail) are never written; they are only
    # read by padded stage-3 rows whose results are discarded below.

    # --- Stage 3: output dense + residual + LayerNorm, tiled over rows ------
    out2d = pl.pallas_call(
        functools.partial(_self_output_kernel, eps=float(layer_norm_eps)),
        out_shape=jax.ShapeDtypeStruct((Mp, H), out_dtype),
        grid=(Mp // tm,),
        in_specs=[
            pl.BlockSpec((tm, H), lambda i: (i, 0)),
            pl.BlockSpec((tm, H), lambda i: (i, 0)),        # residual input
            pl.BlockSpec((H, H), lambda i: (0, 0)),         # resident weights
            pl.BlockSpec((1, H), lambda i: (0, 0)),
            pl.BlockSpec((1, H), lambda i: (0, 0)),
            pl.BlockSpec((1, H), lambda i: (0, 0)),
        ],
        out_specs=pl.BlockSpec((tm, H), lambda i: (i, 0)),
        compiler_params=row_cparams,
    )(ctx2d, x2d_p, prepared["wo_t"], prepared["bo"],
      prepared["ln_gamma"], prepared["ln_beta"])

    return out2d[:M].reshape(B, S, H)


# ----------------------------------------------------------------------------
# Pure-JAX reference for correctness checking
# ----------------------------------------------------------------------------
def _reference(x, params, num_attention_heads, attention_mask=None, eps=1e-12):
    x = x.astype(jnp.float32)
    B, S, H = x.shape
    nH = num_attention_heads
    d = H // nH

    q = x @ params["wq"].T + params["bq"]
    k = x @ params["wk"].T + params["bk"]
    v = x @ params["wv"].T + params["bv"]

    def split(t):
        return t.reshape(B, S, nH, d).transpose(0, 2, 1, 3)

    qh, kh, vh = split(q), split(k), split(v)
    scores = jnp.einsum("bhqd,bhkd->bhqk", qh, kh) / math.sqrt(d)
    if attention_mask is not None:
        scores = scores + attention_mask.reshape(B, 1, 1, S)
    probs = jax.nn.softmax(scores, axis=-1)
    ctx = jnp.einsum("bhqk,bhkd->bhqd", probs, vh)
    ctx = ctx.transpose(0, 2, 1, 3).reshape(B, S, H)

    h = ctx @ params["wo"].T + params["bo"] + x
    mean = jnp.mean(h, axis=-1, keepdims=True)
    var = jnp.mean(jnp.square(h - mean), axis=-1, keepdims=True)
    h = (h - mean) / jnp.sqrt(var + eps)
    return h * params["ln_gamma"] + params["ln_beta"]


if __name__ == "__main__":
    # Small synthetic config
    batch, seq = 2, 8
    hidden_size = 32
    num_heads = 4
    layer_norm_eps = 1e-12

    key = jax.random.PRNGKey(0)
    keys = jax.random.split(key, 12)

    hidden_states = jax.random.normal(
        keys[0], (batch, seq, hidden_size), jnp.float32)

    def w(k):
        return 0.05 * jax.random.normal(k, (hidden_size, hidden_size), jnp.float32)

    def b(k):
        return 0.01 * jax.random.normal(k, (hidden_size,), jnp.float32)

    params = {
        "wq": w(keys[1]), "bq": b(keys[2]),
        "wk": w(keys[3]), "bk": b(keys[4]),
        "wv": w(keys[5]), "bv": b(keys[6]),
        "wo": w(keys[7]), "bo": b(keys[8]),
        "ln_gamma": 1.0 + 0.01 * jax.random.normal(
            keys[9], (hidden_size,), jnp.float32),
        "ln_beta": 0.01 * jax.random.normal(
            keys[10], (hidden_size,), jnp.float32),
    }

    # Additive (extended) attention mask: second sequence has last 2 tokens masked.
    lengths = jnp.array([seq, seq - 2])
    pos = jnp.arange(seq)[None, :]
    attn_mask = jnp.where(pos < lengths[:, None], 0.0, -10000.0)
    attn_mask = attn_mask.astype(jnp.float32).reshape(batch, 1, 1, seq)

    prepared = prepare_albert_attention_params(params, hidden_states.dtype)

    out = albert_attention(hidden_states, prepared,
                           num_attention_heads=num_heads,
                           attention_mask=attn_mask,
                           layer_norm_eps=layer_norm_eps)
    out = jax.block_until_ready(out)

    ref = _reference(hidden_states, params, num_heads,
                     attention_mask=attn_mask, eps=layer_norm_eps)

    assert out.shape == (batch, seq, hidden_size)
    assert jnp.allclose(out, ref, atol=1e-4, rtol=1e-4), "mismatch vs reference"

    print("KERNEL_OK")
</pallas_src>

<mosaic_0001>
module attributes {stable_mosaic.version = 11 : i64} {
  func.func @_qkv_proj_kernel(%arg0: i32, %arg1: memref<16x32xf32, #tpu.memory_space<vmem>>, %arg2: memref<32x96xf32, #tpu.memory_space<vmem>>, %arg3: memref<1x96xf32, #tpu.memory_space<vmem>>, %arg4: memref<16x96xf32, #tpu.memory_space<vmem>>) attributes {dimension_semantics = [#tpu.dimension_semantics<parallel>], iteration_bounds = array<i64: 1>, scalar_prefetch = 0 : i64, scratch_operands = 0 : i64, tpu.core_type = #tpu.core_type<tc>, window_params = [{transform_indices = @transform_0, window_bounds = array<i64: 16, 32>}, {pipeline_mode = #tpu.pipeline_mode<synchronous>, transform_indices = @transform_1, window_bounds = array<i64: 32, 96>}, {pipeline_mode = #tpu.pipeline_mode<synchronous>, transform_indices = @transform_2, window_bounds = array<i64: 1, 96>}, {transform_indices = @transform_3, window_bounds = array<i64: 16, 96>}]} {
    %c0 = arith.constant 0 : index
    %c0_0 = arith.constant 0 : index
    %0 = vector.load %arg1[%c0, %c0_0] : memref<16x32xf32, #tpu.memory_space<vmem>>, vector<16x32xf32>
    %c0_1 = arith.constant 0 : index
    %c0_2 = arith.constant 0 : index
    %1 = vector.load %arg2[%c0_1, %c0_2] : memref<32x96xf32, #tpu.memory_space<vmem>>, vector<32x96xf32>
    %cst = arith.constant dense<0.000000e+00> : vector<16x96xf32>
    %2 = tpu.matmul %0, %1, %cst {dimension_numbers = #tpu.dot_dimension_numbers<[1], [0], [0], [1], [0, 0, 1, 1], [], []>} : vector<16x32xf32>, vector<32x96xf32>, vector<16x96xf32> -> vector<16x96xf32>
    %c0_3 = arith.constant 0 : index
    %c0_4 = arith.constant 0 : index
    %3 = vector.load %arg3[%c0_3, %c0_4] : memref<1x96xf32, #tpu.memory_space<vmem>>, vector<1x96xf32>
    %4 = vector.broadcast %3 : vector<1x96xf32> to vector<16x96xf32>
    %5 = arith.addf %2, %4 : vector<16x96xf32>
    %c0_5 = arith.constant 0 : index
    %c0_6 = arith.constant 0 : index
    %6 = vector.load %arg4[%c0_5, %c0_6] : memref<16x96xf32, #tpu.memory_space<vmem>>, vector<16x96xf32>
    tpu.vector_store %arg4[%c0_5, %c0_6], %5 {strides = array<i32>} : memref<16x96xf32, #tpu.memory_space<vmem>>, vector<16x96xf32>,
    return
  }
  func.func @transform_0(%arg0: i32) -> (i32, i32) {
    %c0_i32 = arith.constant 0 : i32
    %c0_i32_0 = arith.constant 0 : i32
    return %arg0, %c0_i32 : i32, i32
  }
  func.func @transform_1(%arg0: i32) -> (i32, i32) {
    %c0_i32 = arith.constant 0 : i32
    %c0_i32_0 = arith.constant 0 : i32
    %c0_i32_1 = arith.constant 0 : i32
    return %c0_i32, %c0_i32_0 : i32, i32
  }
  func.func @transform_2(%arg0: i32) -> (i32, i32) {
    %c0_i32 = arith.constant 0 : i32
    %c0_i32_0 = arith.constant 0 : i32
    %c0_i32_1 = arith.constant 0 : i32
    return %c0_i32, %c0_i32_0 : i32, i32
  }
  func.func @transform_3(%arg0: i32) -> (i32, i32) {
    %c0_i32 = arith.constant 0 : i32
    %c0_i32_0 = arith.constant 0 : i32
    return %arg0, %c0_i32 : i32, i32
  }
}

</mosaic_0001>

<bundles_post_ra>
// kernel: tpu_custom_call.1
= control target key start
LH: loop header
LB: loop body
LE: loop exit
PB: predicated region body
PF: predicated region fallthrough
CT: control target
= control target key end

     0   :  { %8 = vsyncpa [#allocation3], 0  ;;  %s337_s0 = inlined_call_operand.hbm [shape: f32[16,32], index: 0, kind: input, shape index: {}]   ;;  %s338_s1 = inlined_call_operand.hbm [shape: f32[32,96], index: 1, kind: input, shape index: {}]   ;;  %s339_s2 = inlined_call_operand.vmem [shape: f32[1,96], index: 2, kind: input, shape index: {}]   ;;  %s340_s3 = inlined_call_operand.hbm [shape: f32[16,96], index: 3, kind: output, shape index: {}]  }
   0x1   :  { %9 = vsyncpa [#allocation6], 0 }
   0x2   :  { %10 = vsyncpa [#allocation4], 0  ;;  %s264_s12 = smov [#allocation2]   ;;  %s192_s16 = scalar_lea.hbm %s337_s0, 256 }
   0x3   :  { %s16_s13 = sshll.u32 %s264_s12, 4  ;;  %p193_p0 = scmp.ne.s32.totalorder %s337_s0, %s192_s16  ;;  %s17_s13 = int_to_ptr.vmem [resolvable:$true] %s16_s13 }
   0x4   :  { %p196_p1 = scmp.lt.u32.totalorder %s192_s16, %s337_s0 }
   0x6   :  { %p198_p2 = pnand %p196_p1, %p193_p0 }
   0x8   :  { %201 = shalt.err (!%p198_p2)
}
   0x9   :  { %s202_s21 = scalar_lea.vmem %s17_s13, 256  ;;  %p207_p4 = scmp.lt.s32.totalorder %s17_s13, %s17_s13 }
   0xa   :  { %p203_p3 = scmp.ne.s32.totalorder %s17_s13, %s202_s21  ;;  %p208_p5 = scmp.lt.s32.totalorder %s202_s21, %s202_s21 }
   0xc   :  { %p209_p6 = por %p208_p5, %p207_p4 }
   0xe   :  { %p210_p7 = pnand %p209_p6, %p203_p3 }
  0x10   :  { %213 = shalt.err (!%p210_p7)
}
  0x11   :  { %s265_s22 = smov 128   ;;  %s266_s23 = smov 8  }
  0x12   :  { %22 = dma.hbm_to_vmem [thread:$0]  %s337_s0, 256, %s17_s13, [#allocation3], %s265_s22, %s265_s22, %s266_s23  }
  0x13   :  { %s267_s26 = smov [#allocation5]   ;;  %s214_s30 = scalar_lea.hbm %s338_s1, 512 }
  0x14   :  { %s28_s27 = sshll.u32 %s267_s26, 4  ;;  %p215_p8 = scmp.ne.s32.totalorder %s338_s1, %s214_s30  ;;  %s29_s27 = int_to_ptr.vmem [resolvable:$true] %s28_s27 }
  0x15   :  { %p218_p9 = scmp.lt.u32.totalorder %s214_s30, %s338_s1 }
  0x17   :  { %p220_p10 = pnand %p218_p9, %p215_p8 }
  0x19   :  { %223 = shalt.err (!%p220_p10)
}
  0x1a   :  { %s224_s8 = scalar_lea.vmem %s29_s27, 512  ;;  %p229_p12 = scmp.lt.s32.totalorder %s29_s27, %s29_s27 }
  0x1b   :  { %p225_p11 = scmp.ne.s32.totalorder %s29_s27, %s224_s8  ;;  %p230_p13 = scmp.lt.s32.totalorder %s224_s8, %s224_s8 }
  0x1d   :  { %p231_p0 = por %p230_p13, %p229_p12 }
  0x1f   :  { %p232_p1 = pnand %p231_p0, %p225_p11 }
  0x21   :  { %235 = shalt.err (!%p232_p1)
}
  0x22   :  { %34 = dma.hbm_to_vmem [thread:$0]  %s338_s1, 512, %s29_s27, [#allocation6], %s265_s22, %s265_s22, %s266_s23  }
  0x23   :  { %258 = dma.done.wait [#allocation3], 256  }
  0x24   :  { %259 = vsyncadd [#allocation3], 4294967040 }
  0x25   :  { %260 = dma.done.wait [#allocation6], 512  }
  0x26   :  { %261 = vsyncadd [#allocation6], 4294966784  ;;  %vm56_vm0 = vcmask 261120   ;;  %v45_v0 = vld [vmem:[#allocation5] sm:$0xff]  ;;  %v46_v1 = vld [vmem:[#allocation5 + $0x8] sm:$0xff]  ;;  %s268_s11 = smov [#allocation7]  }
  0x27   :  { %v47_v2 = vld [vmem:[#allocation5 + $0x10] sm:$0xff]  ;;  %v179_v3 = vpack.c.bf16 %v46_v1, %v45_v0  ;;  %v48_v4 = vld [vmem:[#allocation5 + $0x18] sm:$0xff]  ;;  %s146_s12 = sshll.u32 %s268_s11, 4  ;;  %vm138_vm1 = vcmask 785408   ;;  %s147_s12 = int_to_ptr.vmem [resolvable:$true] %s146_s12 }
  0x28   :  { %v43_v5 = vld [vmem:[#allocation2] sm:$0xff]  ;;  %v183_v6 = vpack.c.bf16 %v48_v4, %v47_v2  ;;  %v44_v7 = vld [vmem:[#allocation2 + $0x8] sm:$0xff]  ;;  %s236_s13 = scalar_lea.vmem %s147_s12, 256  ;;  %p241_p3 = scmp.lt.s32.totalorder %s147_s12, %s147_s12 }
  0x29   :  { %176 = vmatprep.mubr.msk.f32.mxu0 %vm56_vm0, %v43_v5  ;;  %180 = vmatprep.subr.bf16.mxu0 %v179_v3  ;;  %v159_v8 = vld [vmem:[%s339_s2] ss:$0 sm:$0xff]  ;;  %p237_p2 = scmp.ne.s32.totalorder %s147_s12, %s236_s13  ;;  %p242_p4 = scmp.lt.s32.totalorder %s236_s13, %s236_s13 }
  0x2a   :  { %182 = vmatpush3.bf16.msra.mxu0 %v179_v3 }
  0x2b   :  { %184 = vmatprep.subr.bf16.mxu0 %v183_v6  ;;  %p243_p5 = por %p242_p4, %p241_p3 }
  0x2d   :  { %p244_p6 = pnand %p243_p5, %p237_p2 }
  0x2e   :  { %186 = vmatpush3.bf16.msra.mxu0 %v183_v6 }
  0x31   :  { %177 = vmatmul.mubr.msk.f32.vlgmr.msra.gmra.mrb[0].mxu0 %vm56_vm0, %v44_v7 }
 0x104   :  { %v178_v9 = vpop.f32.mrb[0].mxu0 }
 0x105   :  { %v135_v10 = vadd.f32 %v178_v9, %v159_v8  ;;  %v129_v11 = vpop.f32.mrb[1].mxu0 }
 0x106   :  { %v130_v12 = vadd.f32 %v159_v8, %v129_v11 }
 0x107   :  { %140 = vst.msk [vmem:[#allocation7 + $0x8] sm:$0xff] %vm138_vm1, %v135_v10 }
 0x108   :  { %139 = vst.msk [vmem:[#allocation7] sm:$0xff] %vm138_vm1, %v130_v12 }
 0x109   :  { %247 = shalt.err (!%p244_p6)
}
 0x10a   :  { %s248_s2 = scalar_lea.hbm %s340_s3, 256 }
 0x10b   :  { %p249_p7 = scmp.ne.s32.totalorder %s340_s3, %s248_s2  ;;  %p252_p8 = scmp.lt.u32.totalorder %s248_s2, %s340_s3 }
 0x10d   :  { %p254_p9 = pnand %p252_p8, %p249_p7 }
 0x10f   :  { %257 = shalt.err (!%p254_p9)
}
 0x110   :  { %152 = dma.vmem_to_hbm [thread:$0]  %s147_s12, 256, %s340_s3, [#allocation4], %s265_s22, %s265_s22, %s266_s23  }
 0x111   :  { %262 = dma.done.wait [#allocation4], 256  }
 0x112   :  { %263 = vsyncadd [#allocation4], 4294967040 }
 0x113   :  { %156 = vsyncpa [#allocation3], 1 }
 0x114   :  { %157 = vsyncpa [#allocation6], 1 }
 0x115   :  { %158 = vsyncpa [#allocation4], 1 }

</bundles_post_ra>
